<compile_context>
chip_gen: v7x
topology: tpu7x:2x2x1
jax: 0.10.0
libtpu: 0.0.40
codegen_flags: <defaults>
</compile_context>

<pallas_src>
import functools

import jax
import jax.numpy as jnp
from jax.experimental import pallas as pl
from jax.experimental.pallas import tpu as pltpu

LANE = 128
MAX_TILE_B = 512  # ~HBM-roofline tile; live footprint still << VMEM everywhere


def _round_up(x, m):
    return (x + m - 1) // m * m


def _choose_tile(batch):
    """Pick a 16-aligned batch tile.

    * tiny batches (action selection): one tile, minimal grid overhead
    * 256..1024: two even grid steps so v7x shards them over its 2 TensorCores
    * bigger: fixed 512-row tiles (many steps; parallel axis shards on v7x)
    """
    b16 = _round_up(max(batch, 1), 16)
    if b16 > 2 * MAX_TILE_B:
        return MAX_TILE_B
    if b16 >= 256:
        return _round_up((b16 + 1) // 2, 16)
    return b16


def mlp_kernel(x_ref, w1_ref, b1_ref, w2_ref, b2_ref, w3_ref, b3_ref, o_ref):
    # fc1 + ReLU: bf16 operands, f32 MXU accumulation, f32 bias/ReLU epilogue.
    h1 = jnp.dot(x_ref[...], w1_ref[...], preferred_element_type=jnp.float32)
    h1 = jnp.maximum(h1 + b1_ref[...], 0.0).astype(jnp.bfloat16)
    # fc2 + ReLU
    h2 = jnp.dot(h1, w2_ref[...], preferred_element_type=jnp.float32)
    h2 = jnp.maximum(h2 + b2_ref[...], 0.0).astype(jnp.bfloat16)
    # fc3 (Q values, no activation); output block is lane-dense (128 wide).
    q = jnp.dot(h2, w3_ref[...], preferred_element_type=jnp.float32)
    o_ref[...] = (q + b3_ref[...]).astype(o_ref.dtype)


def prepare_params(w1, b1, w2, b2, w3, b3):
    """One-time parameter prep, hoisted out of the hot forward path.

    Weights are [in, out] (transposed vs torch's [out, in]).  Casts matmul
    weights to bf16 and pads fc3 columns to a lane-dense width of 128.
    Call at init / target-network sync, not per forward step.
    Returns (act_dim, params_tuple).
    """
    act_dim = w3.shape[1]
    act_pad = _round_up(act_dim, LANE)
    w3_p = jnp.zeros((w3.shape[0], act_pad), jnp.bfloat16)
    w3_p = w3_p.at[:, :act_dim].set(w3.astype(jnp.bfloat16))
    b3_p = jnp.zeros((1, act_pad), jnp.float32)
    b3_p = b3_p.at[:, :act_dim].set(jnp.asarray(b3, jnp.float32).reshape(1, -1))
    params = (
        w1.astype(jnp.bfloat16),
        jnp.asarray(b1, jnp.float32).reshape(1, -1),
        w2.astype(jnp.bfloat16),
        jnp.asarray(b2, jnp.float32).reshape(1, -1),
        w3_p,
        b3_p,
    )
    return act_dim, params


def _pallas_mlp(obs_bf, w1, b1, w2, b2, w3, b3, tile_b):
    B_pad, obs_dim = obs_bf.shape
    h1_dim, h2_dim, act_pad = w1.shape[1], w2.shape[1], w3.shape[1]
    grid = (B_pad // tile_b,)

    flops = 2 * B_pad * (obs_dim * h1_dim + h1_dim * h2_dim + h2_dim * act_pad)
    bytes_accessed = (
        obs_bf.size * 2                                  # bf16 obs in
        + (w1.size + w2.size + w3.size) * 2              # bf16 weights in
        + (b1.size + b2.size + b3.size) * 4              # f32 biases in
        + B_pad * act_pad * 4                            # f32 Q out
    )

    # Weights/biases: same block every grid step -> stay resident in VMEM.
    resident = lambda shape: pl.BlockSpec(shape, lambda i: (0, 0))

    return pl.pallas_call(
        mlp_kernel,
        out_shape=jax.ShapeDtypeStruct((B_pad, act_pad), jnp.float32),
        grid=grid,
        in_specs=[
            pl.BlockSpec((tile_b, obs_dim), lambda i: (i, 0)),  # batch-tiled
            resident(w1.shape), resident(b1.shape),
            resident(w2.shape), resident(b2.shape),
            resident(w3.shape), resident(b3.shape),
        ],
        out_specs=pl.BlockSpec((tile_b, act_pad), lambda i: (i, 0)),
        compiler_params=pltpu.CompilerParams(
            dimension_semantics=("parallel",),   # v7x: shard batch over 2 TCs
        ),
        cost_estimate=pl.CostEstimate(
            flops=flops, transcendentals=0, bytes_accessed=bytes_accessed),
    )(obs_bf, w1, b1, w2, b2, w3, b3)


@functools.partial(jax.jit, static_argnames=("act_dim",))
def dqn_forward(obs, params, *, act_dim):
    """Hot-path forward: obs [B, obs_dim] -> Q [B, act_dim] (f32).

    `params` must come from prepare_params (weights already bf16 / padded).
    """
    w1, b1, w2, b2, w3, b3 = params
    B, _ = obs.shape

    tile_b = _choose_tile(B)
    B_pad = _round_up(B, tile_b)

    obs_bf = obs.astype(jnp.bfloat16)
    if B_pad != B:
        obs_bf = jnp.pad(obs_bf, ((0, B_pad - B), (0, 0)))

    q = _pallas_mlp(obs_bf, w1, b1, w2, b2, w3, b3, tile_b)
    return q[:B, :act_dim]


def init_linear(key, fan_in, fan_out):
    # Matches PyTorch nn.Linear default: U(-1/sqrt(fan_in), 1/sqrt(fan_in)).
    kw, kb = jax.random.split(key)
    bound = 1.0 / jnp.sqrt(jnp.float32(fan_in))
    # Stored as [in, out] (transposed relative to torch's [out, in]).
    w = jax.random.uniform(kw, (fan_in, fan_out), jnp.float32, -bound, bound)
    b = jax.random.uniform(kb, (1, fan_out), jnp.float32, -bound, bound)
    return w, b


def _ref_forward(obs, w1, b1, w2, b2, w3, b3):
    h1 = jnp.maximum(obs @ w1 + b1, 0.0)
    h2 = jnp.maximum(h1 @ w2 + b2, 0.0)
    return h2 @ w3 + b3


if __name__ == "__main__":
    obs_dim, act_dim = 32, 8
    batch = 8

    key = jax.random.PRNGKey(0)
    k_obs, k_obs2, k1, k2, k3 = jax.random.split(key, 5)

    w1, b1 = init_linear(k1, obs_dim, 256)
    w2, b2 = init_linear(k2, 256, 128)
    w3, b3 = init_linear(k3, 128, act_dim)

    # One-time param prep (hoisted out of the per-step forward).
    act_dim_s, params = prepare_params(w1, b1, w2, b2, w3, b3)

    # Small batch (action-selection path): single tile.
    obs = jax.random.normal(k_obs, (batch, obs_dim), jnp.float32)
    q = jax.block_until_ready(dqn_forward(obs, params, act_dim=act_dim_s))
    q_ref = _ref_forward(obs, w1, b1, w2, b2, w3, b3)
    assert q.shape == (batch, act_dim)
    assert q.dtype == jnp.float32
    assert jnp.allclose(q, q_ref, atol=5e-2, rtol=5e-2), float(
        jnp.max(jnp.abs(q - q_ref)))

    # Larger batch (replay-buffer path): 2-step parallel grid.
    big_batch = 256
    obs2 = jax.random.normal(k_obs2, (big_batch, obs_dim), jnp.float32)
    q2 = jax.block_until_ready(dqn_forward(obs2, params, act_dim=act_dim_s))
    q2_ref = _ref_forward(obs2, w1, b1, w2, b2, w3, b3)
    assert q2.shape == (big_batch, act_dim)
    assert jnp.allclose(q2, q2_ref, atol=5e-2, rtol=5e-2), float(
        jnp.max(jnp.abs(q2 - q2_ref)))

    print("KERNEL_OK")
</pallas_src>

<mosaic_0001>
module attributes {stable_mosaic.version = 11 : i64} {
  func.func @mlp_kernel(%arg0: i32, %arg1: memref<16x32xbf16, #tpu.memory_space<vmem>>, %arg2: memref<32x256xbf16, #tpu.memory_space<vmem>>, %arg3: memref<1x256xf32, #tpu.memory_space<vmem>>, %arg4: memref<256x128xbf16, #tpu.memory_space<vmem>>, %arg5: memref<1x128xf32, #tpu.memory_space<vmem>>, %arg6: memref<128x128xbf16, #tpu.memory_space<vmem>>, %arg7: memref<1x128xf32, #tpu.memory_space<vmem>>, %arg8: memref<16x128xf32, #tpu.memory_space<vmem>>) attributes {dimension_semantics = [#tpu.dimension_semantics<parallel>], iteration_bounds = array<i64: 1>, scalar_prefetch = 0 : i64, scratch_operands = 0 : i64, tpu.core_type = #tpu.core_type<tc>, window_params = [{transform_indices = @transform_0, window_bounds = array<i64: 16, 32>}, {pipeline_mode = #tpu.pipeline_mode<synchronous>, transform_indices = @transform_1, window_bounds = array<i64: 32, 256>}, {pipeline_mode = #tpu.pipeline_mode<synchronous>, transform_indices = @transform_2, window_bounds = array<i64: 1, 256>}, {pipeline_mode = #tpu.pipeline_mode<synchronous>, transform_indices = @transform_3, window_bounds = array<i64: 256, 128>}, {pipeline_mode = #tpu.pipeline_mode<synchronous>, transform_indices = @transform_4, window_bounds = array<i64: 1, 128>}, {pipeline_mode = #tpu.pipeline_mode<synchronous>, transform_indices = @transform_5, window_bounds = array<i64: 128, 128>}, {pipeline_mode = #tpu.pipeline_mode<synchronous>, transform_indices = @transform_6, window_bounds = array<i64: 1, 128>}, {transform_indices = @transform_7, window_bounds = array<i64: 16, 128>}]} {
    %c0 = arith.constant 0 : index
    %c0_0 = arith.constant 0 : index
    %0 = vector.load %arg1[%c0, %c0_0] : memref<16x32xbf16, #tpu.memory_space<vmem>>, vector<16x32xbf16>
    %c0_1 = arith.constant 0 : index
    %c0_2 = arith.constant 0 : index
    %1 = vector.load %arg2[%c0_1, %c0_2] : memref<32x256xbf16, #tpu.memory_space<vmem>>, vector<32x256xbf16>
    %cst = arith.constant dense<0.000000e+00> : vector<16x256xf32>
    %2 = tpu.matmul %0, %1, %cst {dimension_numbers = #tpu.dot_dimension_numbers<[1], [0], [0], [1], [0, 0, 1, 1], [], []>} : vector<16x32xbf16>, vector<32x256xbf16>, vector<16x256xf32> -> vector<16x256xf32>
    %c0_3 = arith.constant 0 : index
    %c0_4 = arith.constant 0 : index
    %3 = vector.load %arg3[%c0_3, %c0_4] : memref<1x256xf32, #tpu.memory_space<vmem>>, vector<1x256xf32>
    %4 = vector.broadcast %3 : vector<1x256xf32> to vector<16x256xf32>
    %5 = arith.addf %2, %4 : vector<16x256xf32>
    %cst_5 = arith.constant 0.000000e+00 : f32
    %6 = vector.broadcast %cst_5 : f32 to vector<16x256xf32>
    %7 = arith.maximumf %5, %6 : vector<16x256xf32>
    %8 = arith.truncf %7 : vector<16x256xf32> to vector<16x256xbf16>
    %c0_6 = arith.constant 0 : index
    %c0_7 = arith.constant 0 : index
    %9 = vector.load %arg4[%c0_6, %c0_7] : memref<256x128xbf16, #tpu.memory_space<vmem>>, vector<256x128xbf16>
    %cst_8 = arith.constant dense<0.000000e+00> : vector<16x128xf32>
    %10 = tpu.matmul %8, %9, %cst_8 {dimension_numbers = #tpu.dot_dimension_numbers<[1], [0], [0], [1], [0, 0, 1, 1], [], []>} : vector<16x256xbf16>, vector<256x128xbf16>, vector<16x128xf32> -> vector<16x128xf32>
    %c0_9 = arith.constant 0 : index
    %c0_10 = arith.constant 0 : index
    %11 = vector.load %arg5[%c0_9, %c0_10] : memref<1x128xf32, #tpu.memory_space<vmem>>, vector<1x128xf32>
    %12 = vector.broadcast %11 : vector<1x128xf32> to vector<16x128xf32>
    %13 = arith.addf %10, %12 : vector<16x128xf32>
    %cst_11 = arith.constant 0.000000e+00 : f32
    %14 = vector.broadcast %cst_11 : f32 to vector<16x128xf32>
    %15 = arith.maximumf %13, %14 : vector<16x128xf32>
    %16 = arith.truncf %15 : vector<16x128xf32> to vector<16x128xbf16>
    %c0_12 = arith.constant 0 : index
    %c0_13 = arith.constant 0 : index
    %17 = vector.load %arg6[%c0_12, %c0_13] : memref<128x128xbf16, #tpu.memory_space<vmem>>, vector<128x128xbf16>
    %cst_14 = arith.constant dense<0.000000e+00> : vector<16x128xf32>
    %18 = tpu.matmul %16, %17, %cst_14 {dimension_numbers = #tpu.dot_dimension_numbers<[1], [0], [0], [1], [0, 0, 1, 1], [], []>} : vector<16x128xbf16>, vector<128x128xbf16>, vector<16x128xf32> -> vector<16x128xf32>
    %c0_15 = arith.constant 0 : index
    %c0_16 = arith.constant 0 : index
    %19 = vector.load %arg7[%c0_15, %c0_16] : memref<1x128xf32, #tpu.memory_space<vmem>>, vector<1x128xf32>
    %20 = vector.broadcast %19 : vector<1x128xf32> to vector<16x128xf32>
    %21 = arith.addf %18, %20 : vector<16x128xf32>
    %c0_17 = arith.constant 0 : index
    %c0_18 = arith.constant 0 : index
    %22 = vector.load %arg8[%c0_17, %c0_18] : memref<16x128xf32, #tpu.memory_space<vmem>>, vector<16x128xf32>
    tpu.vector_store %arg8[%c0_17, %c0_18], %21 {strides = array<i32>} : memref<16x128xf32, #tpu.memory_space<vmem>>, vector<16x128xf32>,
    return
  }
  func.func @transform_0(%arg0: i32) -> (i32, i32) {
    %c0_i32 = arith.constant 0 : i32
    %c0_i32_0 = arith.constant 0 : i32
    return %arg0, %c0_i32 : i32, i32
  }
  func.func @transform_1(%arg0: i32) -> (i32, i32) {
    %c0_i32 = arith.constant 0 : i32
    %c0_i32_0 = arith.constant 0 : i32
    %c0_i32_1 = arith.constant 0 : i32
    return %c0_i32, %c0_i32_0 : i32, i32
  }
  func.func @transform_2(%arg0: i32) -> (i32, i32) {
    %c0_i32 = arith.constant 0 : i32
    %c0_i32_0 = arith.constant 0 : i32
    %c0_i32_1 = arith.constant 0 : i32
    return %c0_i32, %c0_i32_0 : i32, i32
  }
  func.func @transform_3(%arg0: i32) -> (i32, i32) {
    %c0_i32 = arith.constant 0 : i32
    %c0_i32_0 = arith.constant 0 : i32
    %c0_i32_1 = arith.constant 0 : i32
    return %c0_i32, %c0_i32_0 : i32, i32
  }
  func.func @transform_4(%arg0: i32) -> (i32, i32) {
    %c0_i32 = arith.constant 0 : i32
    %c0_i32_0 = arith.constant 0 : i32
    %c0_i32_1 = arith.constant 0 : i32
    return %c0_i32, %c0_i32_0 : i32, i32
  }
  func.func @transform_5(%arg0: i32) -> (i32, i32) {
    %c0_i32 = arith.constant 0 : i32
    %c0_i32_0 = arith.constant 0 : i32
    %c0_i32_1 = arith.constant 0 : i32
    return %c0_i32, %c0_i32_0 : i32, i32
  }
  func.func @transform_6(%arg0: i32) -> (i32, i32) {
    %c0_i32 = arith.constant 0 : i32
    %c0_i32_0 = arith.constant 0 : i32
    %c0_i32_1 = arith.constant 0 : i32
    return %c0_i32, %c0_i32_0 : i32, i32
  }
  func.func @transform_7(%arg0: i32) -> (i32, i32) {
    %c0_i32 = arith.constant 0 : i32
    %c0_i32_0 = arith.constant 0 : i32
    return %arg0, %c0_i32 : i32, i32
  }
}

</mosaic_0001>

<bundles_post_ra>
// kernel: dqn_forward.1
= control target key start
LH: loop header
LB: loop body
LE: loop exit
PB: predicated region body
PF: predicated region fallthrough
CT: control target
= control target key end

     0   :  { %12 = vsyncpa [#allocation3], 0  ;;  %s767_s0 = inlined_call_operand.vmem [shape: bf16[16,32], index: 0, kind: input, shape index: {}]   ;;  %s768_s1 = inlined_call_operand.hbm [shape: bf16[32,256], index: 1, kind: input, shape index: {}]   ;;  %s769_s2 = inlined_call_operand.vmem [shape: f32[1,256], index: 2, kind: input, shape index: {}]   ;;  %s770_s3 = inlined_call_operand.hbm [shape: bf16[256,128], index: 3, kind: input, shape index: {}]   ;;  %s771_s4 = inlined_call_operand.vmem [shape: f32[1,128], index: 4, kind: input, shape index: {}]   ;;  %s772_s5 = inlined_call_operand.hbm [shape: bf16[128,128], index: 5, kind: input, shape index: {}]   ;;  %s773_s6 = inlined_call_operand.vmem [shape: f32[1,128], index: 6, kind: input, shape index: {}]   ;;  %s774_s7 = inlined_call_operand.vmem [shape: f32[16,128], index: 7, kind: output, shape index: {}]  }
   0x1   :  { %13 = vsyncpa [#allocation5], 0  ;;  %s657_s24 = smov [#allocation4]   ;;  %s587_s28 = scalar_lea.hbm %s770_s3, 2048 }
   0x2   :  { %s35_s25 = sshll.u32 %s657_s24, 4  ;;  %p588_p0 = scmp.ne.s32.totalorder %s770_s3, %s587_s28  ;;  %s36_s25 = int_to_ptr.vmem [resolvable:$true] %s35_s25 }
   0x3   :  { %p591_p1 = scmp.lt.u32.totalorder %s587_s28, %s770_s3 }
   0x5   :  { %p593_p2 = pnand %p591_p1, %p588_p0 }
   0x7   :  { %596 = shalt.err (!%p593_p2)
}
   0x8   :  { %s597_s10 = scalar_lea.vmem %s36_s25, 2048  ;;  %p602_p4 = scmp.lt.s32.totalorder %s36_s25, %s36_s25 }
   0x9   :  { %p598_p3 = scmp.ne.s32.totalorder %s36_s25, %s597_s10  ;;  %p603_p5 = scmp.lt.s32.totalorder %s597_s10, %s597_s10 }
   0xb   :  { %p604_p6 = por %p603_p5, %p602_p4 }
   0xd   :  { %p605_p7 = pnand %p604_p6, %p598_p3 }
   0xf   :  { %608 = shalt.err (!%p605_p7)
}
  0x10   :  { %s658_s11 = smov 64   ;;  %s659_s12 = smov 4  }
  0x11   :  { %41 = dma.hbm_to_vmem [thread:$0]  %s770_s3, 2048, %s36_s25, [#allocation5], %s658_s11, %s658_s11, %s659_s12  }
  0x12   :  { %s660_s15 = smov [#allocation2]   ;;  %s609_s19 = scalar_lea.hbm %s768_s1, 512 }
  0x13   :  { %s21_s16 = sshll.u32 %s660_s15, 4  ;;  %p610_p8 = scmp.ne.s32.totalorder %s768_s1, %s609_s19  ;;  %s22_s16 = int_to_ptr.vmem [resolvable:$true] %s21_s16 }
  0x14   :  { %p613_p9 = scmp.lt.u32.totalorder %s609_s19, %s768_s1 }
  0x16   :  { %p615_p10 = pnand %p613_p9, %p610_p8 }
  0x18   :  { %618 = shalt.err (!%p615_p10)
}
  0x19   :  { %s619_s24 = scalar_lea.vmem %s22_s16, 512  ;;  %p624_p12 = scmp.lt.s32.totalorder %s22_s16, %s22_s16 }
  0x1a   :  { %p620_p11 = scmp.ne.s32.totalorder %s22_s16, %s619_s24  ;;  %p625_p13 = scmp.lt.s32.totalorder %s619_s24, %s619_s24 }
  0x1c   :  { %p626_p0 = por %p625_p13, %p624_p12 }
  0x1e   :  { %p627_p1 = pnand %p626_p0, %p620_p11 }
  0x20   :  { %630 = shalt.err (!%p627_p1)
}
  0x21   :  { %s661_s3 = smov 128   ;;  %s662_s25 = smov 8  }
  0x22   :  { %27 = dma.hbm_to_vmem [thread:$0]  %s768_s1, 512, %s22_s16, [#allocation3], %s661_s3, %s661_s3, %s662_s25  }
  0x23   :  { %s663_s28 = smov [#allocation6]   ;;  %s631_s9 = scalar_lea.hbm %s772_s5, 1024 }
  0x24   :  { %s49_s29 = sshll.u32 %s663_s28, 4  ;;  %p632_p2 = scmp.ne.s32.totalorder %s772_s5, %s631_s9  ;;  %s50_s29 = int_to_ptr.vmem [resolvable:$true] %s49_s29 }
  0x25   :  { %p635_p3 = scmp.lt.u32.totalorder %s631_s9, %s772_s5 }
  0x27   :  { %p637_p4 = pnand %p635_p3, %p632_p2 }
  0x29   :  { %640 = shalt.err (!%p637_p4)
}
  0x2a   :  { %s641_s17 = scalar_lea.vmem %s50_s29, 1024  ;;  %p646_p6 = scmp.lt.s32.totalorder %s50_s29, %s50_s29 }
  0x2b   :  { %p642_p5 = scmp.ne.s32.totalorder %s50_s29, %s641_s17  ;;  %p647_p7 = scmp.lt.s32.totalorder %s641_s17, %s641_s17 }
  0x2d   :  { %p648_p8 = por %p647_p7, %p646_p6 }
  0x2f   :  { %p649_p9 = pnand %p648_p8, %p642_p5 }
  0x31   :  { %652 = shalt.err (!%p649_p9)
}
  0x32   :  { %55 = dma.hbm_to_vmem [thread:$0]  %s772_s5, 1024, %s50_s29, [#allocation5], %s658_s11, %s658_s11, %s659_s12  }
  0x33   :  { %653 = dma.done.wait [#allocation3], 512  }
  0x34   :  { %654 = vsyncadd [#allocation3], 4294966784 }
  0x35   :  { %655 = dma.done.wait [#allocation5], 3072  }
  0x36   :  { %656 = vsyncadd [#allocation5], 4294964224  ;;  %v664_v0 = vmov 0   ;;  %v556_v1 = vld [vmem:[#allocation2 + $0x4] ss:$8 sps:$4 sm:$0xff]   ;;  %vm111_vm0 = vcmask 261120   ;;  %v76_v28 = vlaneseq }
  0x37   :  { %147 = vmatprep.mubr.bf16.mxu0 %v664_v0  ;;  %v558_v2 = vld [vmem:[#allocation2] ss:$8 sps:$4 sm:$0xff]   ;;  %115 = vmatprep.subr.bf16.mxu0 %v556_v1  ;;  %v559_v3 = vld [vmem:[#allocation2 + $0x14] ss:$8 sps:$4 sm:$0xff]   ;;  %v561_v4 = vld [vmem:[#allocation2 + $0x10] ss:$8 sps:$4 sm:$0xff]  }
  0x38   :  { %116 = vmatpush1.bf16.msra.mxu0 %v558_v2  ;;  %v562_v5 = vld [vmem:[%s767_s0] sm:$0xff]   ;;  %v565_v8 = vld [vmem:[#allocation4 + $0x48] sm:$0xff]   ;;  %v567_v10 = vld [vmem:[#allocation4 + $0x50] sm:$0xff]   ;;  %v665_v23 = vmov 0.0   ;;  %v77_v29 = vshrl.u32 %v76_v28, 7  ;;  %vm666_vm1 = vmmov 0  }
  0x39   :  { %117 = vmatprep.subr.bf16.mxu0 %v559_v3  ;;  %v563_v6 = vld [vmem:[#allocation4 + $0x40] sm:$0xff]   ;;  %v566_v9 = vld [vmem:[#allocation4 + $0x8] sm:$0xff]   ;;  %v568_v11 = vld [vmem:[#allocation4 + $0x10] sm:$0xff]  }
  0x3a   :  { %v564_v7 = vld [vmem:[#allocation4] sm:$0xff]   ;;  %495 = vmatprep.subr.bf16.mxu1 %v563_v6  ;;  %v569_v12 = vld [vmem:[#allocation4 + $0x58] sm:$0xff]   ;;  %v573_v16 = vld [vmem:[#allocation4 + $0x68] sm:$0xff]   ;;  %v78_v30 = vsub.s32 0, %v77_v29  ;;  %v82_v32 = vsub.s32 1, %v77_v29 }
  0x3b   :  { %496 = vmatpush3.bf16.msra.mxu1 %v564_v7  ;;  %v570_v13 = vld [vmem:[#allocation4 + $0x18] sm:$0xff]   ;;  %v571_v14 = vld [vmem:[#allocation4 + $0x60] sm:$0xff]   ;;  %v574_v17 = vld [vmem:[#allocation4 + $0x28] sm:$0xff]  }
  0x3c   :  { %118 = vmatpush1.bf16.msra.mxu0 %v561_v4  ;;  %497 = vmatprep.subr.bf16.mxu1 %v565_v8  ;;  %v572_v15 = vld [vmem:[#allocation4 + $0x20] sm:$0xff]   ;;  %v575_v18 = vld [vmem:[#allocation4 + $0x70] sm:$0xff]   ;;  %v577_v20 = vld [vmem:[#allocation4 + $0x78] sm:$0xff]  }
  0x3d   :  { %v576_v19 = vld [vmem:[#allocation4 + $0x30] sm:$0xff]   ;;  %v578_v21 = vld [vmem:[#allocation4 + $0x38] sm:$0xff]   ;;  %v579_v22 = vld [vmem:[#allocation6] sm:$0xff]   ;;  %526 = vmatprep.subr.bf16.mxu0 %v665_v23 }
  0x3e   :  { %v580_v24 = vld [vmem:[#allocation6 + $0x8] sm:$0xff]   ;;  %v581_v25 = vld [vmem:[#allocation6 + $0x10] sm:$0xff]   ;;  %v582_v26 = vld [vmem:[#allocation6 + $0x18] sm:$0xff]  }
  0x3f   :  { %468 = vmatmul.mubr.msk.bf16.vlgmr.msra.gmra.mrb[0].mxu0 %vm111_vm0, %v562_v5  ;;  %498 = vmatpush3.bf16.msra.mxu1 %v566_v9  ;;  %v583_v27 = vld [vmem:[#allocation6 + $0x20] sm:$0xff]   ;;  %v584_v49 = vld [vmem:[#allocation6 + $0x28] sm:$0xff]   ;;  %v585_v50 = vld [vmem:[#allocation6 + $0x30] sm:$0xff]  }
  0x40   :  { %499 = vmatprep.subr.bf16.mxu1 %v567_v10  ;;  %527 = vmatpush3.bf16.msra.mxu0 %v579_v22  ;;  %v74_v31 = vld [vmem:[%s769_s2] sm:$0x3]  ;;  %v586_v51 = vld [vmem:[#allocation6 + $0x38] sm:$0xff]  }
  0x41   :  { %528 = vmatprep.subr.bf16.mxu0 %v665_v23  ;;  %v79_v33 = vrot.slane %v74_v31, %v78_v30  ;;  %v83_v34 = vrot.slane %v74_v31, %v82_v32  ;;  %542 = vmatprep.mubr.msk.bf16.mxu0 %vm666_vm1, %v665_v23  ;;  %v469_v53 = vld [vmem:[%s771_s4] ss:$0 sm:$0xff] }
  0x42   :  { %v486_v0 = vld [vmem:[%s773_s6] ss:$0 sm:$0xff] }
  0x43   :  { %500 = vmatpush3.bf16.msra.mxu1 %v568_v11 }
  0x44   :  { %501 = vmatprep.subr.bf16.mxu1 %v569_v12  ;;  %529 = vmatpush3.bf16.msra.mxu0 %v580_v24 }
  0x45   :  { %530 = vmatprep.subr.bf16.mxu0 %v665_v23 }
  0x47   :  { %502 = vmatpush3.bf16.msra.mxu1 %v570_v13 }
  0x48   :  { %503 = vmatprep.subr.bf16.mxu1 %v571_v14  ;;  %531 = vmatpush3.bf16.msra.mxu0 %v581_v25 }
  0x49   :  { %532 = vmatprep.subr.bf16.mxu0 %v665_v23 }
  0x4b   :  { %504 = vmatpush3.bf16.msra.mxu1 %v572_v15 }
  0x4c   :  { %505 = vmatprep.subr.bf16.mxu1 %v573_v16  ;;  %533 = vmatpush3.bf16.msra.mxu0 %v582_v26 }
  0x4d   :  { %534 = vmatprep.subr.bf16.mxu0 %v665_v23 }
  0x4f   :  { %506 = vmatpush3.bf16.msra.mxu1 %v574_v17 }
  0x50   :  { %507 = vmatprep.subr.bf16.mxu1 %v575_v18  ;;  %535 = vmatpush3.bf16.msra.mxu0 %v583_v27 }
  0x51   :  { %536 = vmatprep.subr.bf16.mxu0 %v665_v23 }
  0x53   :  { %508 = vmatpush3.bf16.msra.mxu1 %v576_v19 }
  0x54   :  { %509 = vmatprep.subr.bf16.mxu1 %v577_v20  ;;  %537 = vmatpush3.bf16.msra.mxu0 %v584_v49 }
  0x55   :  { %538 = vmatprep.subr.bf16.mxu0 %v665_v23 }
  0x57   :  { %510 = vmatpush3.bf16.msra.mxu1 %v578_v21 }
  0x58   :  { %539 = vmatpush3.bf16.msra.mxu0 %v585_v50 }
  0x59   :  { %540 = vmatprep.subr.bf16.mxu0 %v665_v23 }
  0x5c   :  { %541 = vmatpush3.bf16.msra.mxu0 %v586_v51 }
 0x112   :  { %v149_v35 = vpop.f32.mrb[0].mxu0 }
 0x113   :  { %v150_v36 = vadd.f32 %v149_v35, %v79_v33  ;;  %v151_v37 = vpop.f32.mrb[1].mxu0 }
 0x114   :  { %v152_v38 = vadd.f32 %v151_v37, %v83_v34  ;;  %v153_v39 = vpop.f32.mrb[2].mxu0 }
 0x115   :  { %v154_v40 = vadd.f32 %v153_v39, %v79_v33  ;;  %v155_v41 = vpop.f32.mrb[3].mxu0  ;;  %v158_v43 = vmax.f32 %v150_v36, 0.0 }
 0x116   :  { %v156_v42 = vadd.f32 %v155_v41, %v83_v34  ;;  %v159_v45 = vmax.f32 %v152_v38, 0.0 }
 0x117   :  { %v160_v44 = vmax.f32 %v154_v40, 0.0 }
 0x118   :  { %v161_v46 = vmax.f32 %v156_v42, 0.0 }
 0x119   :  { %v162_v47 = vpack.c.bf16 %v160_v44, %v158_v43 }
 0x11a   :  { %v163_v48 = vpack.c.bf16 %v161_v46, %v159_v45 }
 0x11c   :  { %331 = vmatprep.mubr.bf16.mxu1 %v163_v48 }
 0x11d   :  { %332 = vmatmul.mubr.bf16.vlgmr.msra.gmra.mrb[0].mxu1 %v162_v47 }
 0x1f0   :  { %v511_v52 = vpop.f32.mrb[0].mxu1 }
 0x1f1   :  { %v512_v54 = vpop.f32.mrb[1].mxu1 }
 0x1f2   :  { %v513_v55 = vadd.f32 %v512_v54, %v511_v52  ;;  %v514_v56 = vpop.f32.mrb[2].mxu1 }
 0x1f3   :  { %v515_v57 = vpop.f32.mrb[3].mxu1 }
 0x1f4   :  { %v334_v58 = vadd.f32 %v513_v55, %v469_v53  ;;  %v516_v59 = vadd.f32 %v515_v57, %v514_v56 }
 0x1f6   :  { %v337_v60 = vadd.f32 %v516_v59, %v469_v53  ;;  %v340_v61 = vmax.f32 %v334_v58, 0.0 }
 0x1f8   :  { %v341_v62 = vmax.f32 %v337_v60, 0.0 }
 0x1fa   :  { %v342_v63 = vpack.c.bf16 %v341_v62, %v340_v61 }
 0x1fc   :  { %543 = vmatmul.mubr.bf16.vlgmr.msra.gmra.mrb[4].mxu0 %v342_v63 }
 0x2cf   :  { %v448_v1 = vpop.f32.mrb[4].mxu0 }
 0x2d0   :  { %v449_v2 = vadd.f32 %v486_v0, %v448_v1  ;;  %v544_v3 = vpop.f32.mrb[5].mxu0 }
 0x2d1   :  { %v451_v4 = vpop.f32.mrb[6].mxu0 }
 0x2d2   :  { %455 = vst [vmem:[%s774_s7] sm:$0xff] %v449_v2  ;;  %v452_v5 = vadd.f32 %v486_v0, %v451_v4  ;;  %v545_v6 = vpop.f32.mrb[7].mxu0 }
 0x2d4   :  { %456 = vst [vmem:[%s774_s7 + $0x8] sm:$0xff] %v452_v5 }
 0x2d5   :  { %461 = vsyncpa [#allocation3], 1 }
 0x2d6   :  { %462 = vsyncpa [#allocation5], 1 }

</bundles_post_ra>
